<compile_context>
chip_gen: v5e
topology: v5e:2x2
jax: 0.10.0
libtpu: 0.0.40
codegen_flags: <defaults>
</compile_context>

<pallas_src>
import functools

import jax
import jax.numpy as jnp
from jax.experimental import pallas as pl
from jax.experimental.pallas import tpu as pltpu


def _round_up(v, m):
    return (v + m - 1) // m * m


def _tree_sum(vals):
    """Pairwise reduction: f32 adds are not reassociated by the compiler, so
    shorten the dependent-add chain explicitly (9 terms -> depth 4)."""
    vals = list(vals)
    while len(vals) > 1:
        nxt = [vals[i] + vals[i + 1] for i in range(0, len(vals) - 1, 2)]
        if len(vals) % 2:
            nxt.append(vals[-1])
        vals = nxt
    return vals[0]


def _convt_sigmoid_kernel(x_ref, w_ref, b_ref, o_ref, *,
                          n_batch, cout, kh, kw, wout, hw_out, pad_left):
    """Entire batch in ONE grid step (no grid): static loop over n.

    x_ref: (N, Cin, L)   zero-padded input; per sample the real data occupies
                         lanes [pad_left, pad_left + H*Wout), row-major (H, Wout)
    w_ref: (kh*kw*cout, Cin), w_ref[(ky*kw+kx)*cout + co, ci] = W[ci, co, ky, kx]
    b_ref: (cout, 1)
    o_ref: (N, cout, hw_out)   hw_out = Hout*Wout (lane-dense output, >=128 lanes)
    """
    w = w_ref[...]
    b = b_ref[...]
    for n in range(n_batch):                      # static; independent pipelines
        x = x_ref[n]                              # (Cin, L)
        # One MXU matmul per sample: every (tap, cout) response for every pixel.
        z = jnp.dot(w, x, preferred_element_type=jnp.float32)    # (kh*kw*cout, L)
        # Transposed conv (stride=1), scatter form: out[p] = sum_t z_t[p - off_t].
        # With the left zero padding each tap is a STATIC lane slice of z.
        slabs = []
        for t in range(kh * kw):
            ky, kx = divmod(t, kw)
            start = pad_left - (ky * wout + kx)                  # static, >= 0
            slabs.append(z[t * cout:(t + 1) * cout, start:start + hw_out])
        acc = _tree_sum(slabs)                                   # (cout, hw_out)
        o_ref[n] = jax.nn.sigmoid(acc + b)


def prepare_params(weight, bias):
    """One-time parameter repack (hoisted out of the per-call hot path).

    weight: (Cin, Cout, kH, kW)  -- PyTorch ConvTranspose2d layout
    bias:   (Cout,)
    Returns (w_all, b_col) with
      w_all[(ky*kW+kx)*Cout + co, ci] = weight[ci, co, ky, kx]
    (no kernel flip is needed in the scatter form of a transposed conv).
    """
    Cin, Cout, kH, kW = weight.shape
    w_all = jnp.transpose(weight, (2, 3, 1, 0)).reshape(kH * kW * Cout, Cin)
    b_col = bias.reshape(Cout, 1)
    return jnp.asarray(w_all), jnp.asarray(b_col)


@functools.partial(jax.jit, static_argnames=("kh", "kw"))
def conv_transpose2d_sigmoid(x, w_all, b_col, *, kh=3, kw=3):
    """x: (N, Cin, H, W) NCHW; (w_all, b_col) from prepare_params().
    Returns sigmoid(conv_transpose2d(x)) in NCHW, stride=1, padding=0."""
    N, Cin, H, W = x.shape
    Cout = b_col.shape[0]
    Hout, Wout = H + kh - 1, W + kw - 1
    HW_out = Hout * Wout
    HW_in = H * Wout
    pad_left = (kh - 1) * Wout + (kw - 1)          # max tap offset
    L = _round_up(pad_left + HW_out, 128)          # lane-padded width

    # Tiny wrapper-side prep on x only (fuses into one XLA pad/reshape fusion):
    # pad W -> Wout (row gap), flatten (H, Wout) row-major, add left/right zeros.
    x_pw = jnp.pad(x, ((0, 0), (0, 0), (0, 0), (0, Wout - W)))
    x_flat = jnp.pad(x_pw.reshape(N, Cin, HW_in),
                     ((0, 0), (0, 0), (pad_left, L - pad_left - HW_in)))

    kernel = functools.partial(
        _convt_sigmoid_kernel, n_batch=N, cout=Cout, kh=kh, kw=kw,
        wout=Wout, hw_out=HW_out, pad_left=pad_left)

    out_flat = pl.pallas_call(
        kernel,
        out_shape=jax.ShapeDtypeStruct((N, Cout, HW_out), jnp.float32),
        # No grid: single step, whole arrays resident in VMEM (~40 KB total).
        in_specs=[
            pl.BlockSpec(memory_space=pltpu.MemorySpace.VMEM),   # x_flat
            pl.BlockSpec(memory_space=pltpu.MemorySpace.VMEM),   # w_all
            pl.BlockSpec(memory_space=pltpu.MemorySpace.VMEM),   # b_col
        ],
        out_specs=pl.BlockSpec(memory_space=pltpu.MemorySpace.VMEM),
    )(x_flat, w_all, b_col)

    # (N, Cout, Hout*Wout) -> (N, Cout, Hout, Wout): contiguous split, no copy.
    return out_flat.reshape(N, Cout, Hout, Wout)


def _reference_convt_sigmoid(x, weight, bias):
    """Independent gather-form reference: pad by (k-1) + flipped-kernel corr."""
    N, Cin, H, W = x.shape
    _, Cout, kH, kW = weight.shape
    Hout, Wout = H + kH - 1, W + kW - 1
    xp = jnp.pad(x, ((0, 0), (0, 0), (kH - 1, kH - 1), (kW - 1, kW - 1)))
    wf = weight[:, :, ::-1, ::-1]
    out = jnp.zeros((N, Cout, Hout, Wout), jnp.float32)
    for ky in range(kH):
        for kx in range(kW):
            patch = xp[:, :, ky:ky + Hout, kx:kx + Wout]      # (N, Cin, Hout, Wout)
            out = out + jnp.einsum('nchw,cd->ndhw', patch, wf[:, :, ky, kx],
                                   precision='highest')
    out = out + bias[None, :, None, None]
    return jax.nn.sigmoid(out)


if __name__ == "__main__":
    key = jax.random.PRNGKey(0)
    k_x, k_w, k_b = jax.random.split(key, 3)

    N, Cin, H, W = 2, 4, 16, 16
    Cout, kH, kW = 8, 3, 3

    x1 = jax.random.normal(k_x, (N, Cin, H, W), dtype=jnp.float32)
    bound = 1.0 / (Cin * kH * kW) ** 0.5
    weight = jax.random.uniform(k_w, (Cin, Cout, kH, kW),
                                minval=-bound, maxval=bound, dtype=jnp.float32)
    bias = jax.random.uniform(k_b, (Cout,), minval=-bound, maxval=bound,
                              dtype=jnp.float32)

    # Parameter repack happens ONCE, outside the per-call hot path.
    w_all, b_col = prepare_params(weight, bias)

    out = conv_transpose2d_sigmoid(x1, w_all, b_col, kh=kH, kw=kW)
    out = jax.block_until_ready(out)
    assert out.shape == (N, Cout, H + kH - 1, W + kW - 1), out.shape

    ref = _reference_convt_sigmoid(x1, weight, bias)
    max_err = float(jnp.max(jnp.abs(out - ref)))
    assert jnp.allclose(out, ref, atol=5e-3, rtol=0.0), max_err

    print("KERNEL_OK")
</pallas_src>

<mosaic_0001>
module attributes {stable_mosaic.version = 11 : i64} {
  func.func @_convt_sigmoid_kernel(%arg0: memref<2x4x384xf32, #tpu.memory_space<vmem>>, %arg1: memref<72x4xf32, #tpu.memory_space<vmem>>, %arg2: memref<8x1xf32, #tpu.memory_space<vmem>>, %arg3: memref<2x8x324xf32, #tpu.memory_space<vmem>>) attributes {dimension_semantics = [], scalar_prefetch = 0 : i64, scratch_operands = 0 : i64, tpu.core_type = #tpu.core_type<tc>} {
    %c0 = arith.constant 0 : index
    %c0_0 = arith.constant 0 : index
    %0 = vector.load %arg1[%c0, %c0_0] : memref<72x4xf32, #tpu.memory_space<vmem>>, vector<72x4xf32>
    %c0_1 = arith.constant 0 : index
    %c0_2 = arith.constant 0 : index
    %1 = vector.load %arg2[%c0_1, %c0_2] : memref<8x1xf32, #tpu.memory_space<vmem>>, vector<8x1xf32>
    %c0_3 = arith.constant 0 : index
    %c0_4 = arith.constant 0 : index
    %c0_5 = arith.constant 0 : index
    %2 = vector.load %arg0[%c0_3, %c0_4, %c0_5] : memref<2x4x384xf32, #tpu.memory_space<vmem>>, vector<1x4x384xf32>
    %3 = vector.shape_cast %2 : vector<1x4x384xf32> to vector<4x384xf32>
    %cst = arith.constant dense<0.000000e+00> : vector<72x384xf32>
    %4 = tpu.matmul %0, %3, %cst {dimension_numbers = #tpu.dot_dimension_numbers<[1], [0], [0], [1], [0, 0, 1, 1], [], []>} : vector<72x4xf32>, vector<4x384xf32>, vector<72x384xf32> -> vector<72x384xf32>
    %5 = vector.extract_strided_slice %4 {offsets = [0, 38], sizes = [8, 324], strides = [1, 1]} : vector<72x384xf32> to vector<8x324xf32>
    %6 = vector.extract_strided_slice %4 {offsets = [8, 37], sizes = [8, 324], strides = [1, 1]} : vector<72x384xf32> to vector<8x324xf32>
    %7 = vector.extract_strided_slice %4 {offsets = [16, 36], sizes = [8, 324], strides = [1, 1]} : vector<72x384xf32> to vector<8x324xf32>
    %8 = vector.extract_strided_slice %4 {offsets = [24, 20], sizes = [8, 324], strides = [1, 1]} : vector<72x384xf32> to vector<8x324xf32>
    %9 = vector.extract_strided_slice %4 {offsets = [32, 19], sizes = [8, 324], strides = [1, 1]} : vector<72x384xf32> to vector<8x324xf32>
    %10 = vector.extract_strided_slice %4 {offsets = [40, 18], sizes = [8, 324], strides = [1, 1]} : vector<72x384xf32> to vector<8x324xf32>
    %11 = vector.extract_strided_slice %4 {offsets = [48, 2], sizes = [8, 324], strides = [1, 1]} : vector<72x384xf32> to vector<8x324xf32>
    %12 = vector.extract_strided_slice %4 {offsets = [56, 1], sizes = [8, 324], strides = [1, 1]} : vector<72x384xf32> to vector<8x324xf32>
    %13 = vector.extract_strided_slice %4 {offsets = [64, 0], sizes = [8, 324], strides = [1, 1]} : vector<72x384xf32> to vector<8x324xf32>
    %14 = arith.addf %5, %6 : vector<8x324xf32>
    %15 = arith.addf %7, %8 : vector<8x324xf32>
    %16 = arith.addf %9, %10 : vector<8x324xf32>
    %17 = arith.addf %11, %12 : vector<8x324xf32>
    %18 = arith.addf %14, %15 : vector<8x324xf32>
    %19 = arith.addf %16, %17 : vector<8x324xf32>
    %20 = arith.addf %18, %19 : vector<8x324xf32>
    %21 = arith.addf %20, %13 : vector<8x324xf32>
    %22 = vector.broadcast %1 : vector<8x1xf32> to vector<8x324xf32>
    %23 = arith.addf %21, %22 : vector<8x324xf32>
    %24 = arith.negf %23 : vector<8x324xf32>
    %25 = math.exp %24 : vector<8x324xf32>
    %cst_6 = arith.constant 1.000000e+00 : f32
    %26 = vector.broadcast %cst_6 : f32 to vector<8x324xf32>
    %27 = arith.addf %26, %25 : vector<8x324xf32>
    %28 = arith.divf %26, %27 : vector<8x324xf32>
    %c0_7 = arith.constant 0 : index
    %c0_8 = arith.constant 0 : index
    %c0_9 = arith.constant 0 : index
    %29 = vector.load %arg3[%c0_7, %c0_8, %c0_9] : memref<2x8x324xf32, #tpu.memory_space<vmem>>, vector<1x8x324xf32>
    %30 = vector.shape_cast %29 : vector<1x8x324xf32> to vector<8x324xf32>
    %31 = vector.shape_cast %28 : vector<8x324xf32> to vector<1x8x324xf32>
    tpu.vector_store %arg3[%c0_7, %c0_8, %c0_9], %31 {strides = array<i32>} : memref<2x8x324xf32, #tpu.memory_space<vmem>>, vector<1x8x324xf32>,
    %c1 = arith.constant 1 : index
    %c0_10 = arith.constant 0 : index
    %c0_11 = arith.constant 0 : index
    %32 = vector.load %arg0[%c1, %c0_10, %c0_11] : memref<2x4x384xf32, #tpu.memory_space<vmem>>, vector<1x4x384xf32>
    %33 = vector.shape_cast %32 : vector<1x4x384xf32> to vector<4x384xf32>
    %cst_12 = arith.constant dense<0.000000e+00> : vector<72x384xf32>
    %34 = tpu.matmul %0, %33, %cst_12 {dimension_numbers = #tpu.dot_dimension_numbers<[1], [0], [0], [1], [0, 0, 1, 1], [], []>} : vector<72x4xf32>, vector<4x384xf32>, vector<72x384xf32> -> vector<72x384xf32>
    %35 = vector.extract_strided_slice %34 {offsets = [0, 38], sizes = [8, 324], strides = [1, 1]} : vector<72x384xf32> to vector<8x324xf32>
    %36 = vector.extract_strided_slice %34 {offsets = [8, 37], sizes = [8, 324], strides = [1, 1]} : vector<72x384xf32> to vector<8x324xf32>
    %37 = vector.extract_strided_slice %34 {offsets = [16, 36], sizes = [8, 324], strides = [1, 1]} : vector<72x384xf32> to vector<8x324xf32>
    %38 = vector.extract_strided_slice %34 {offsets = [24, 20], sizes = [8, 324], strides = [1, 1]} : vector<72x384xf32> to vector<8x324xf32>
    %39 = vector.extract_strided_slice %34 {offsets = [32, 19], sizes = [8, 324], strides = [1, 1]} : vector<72x384xf32> to vector<8x324xf32>
    %40 = vector.extract_strided_slice %34 {offsets = [40, 18], sizes = [8, 324], strides = [1, 1]} : vector<72x384xf32> to vector<8x324xf32>
    %41 = vector.extract_strided_slice %34 {offsets = [48, 2], sizes = [8, 324], strides = [1, 1]} : vector<72x384xf32> to vector<8x324xf32>
    %42 = vector.extract_strided_slice %34 {offsets = [56, 1], sizes = [8, 324], strides = [1, 1]} : vector<72x384xf32> to vector<8x324xf32>
    %43 = vector.extract_strided_slice %34 {offsets = [64, 0], sizes = [8, 324], strides = [1, 1]} : vector<72x384xf32> to vector<8x324xf32>
    %44 = arith.addf %35, %36 : vector<8x324xf32>
    %45 = arith.addf %37, %38 : vector<8x324xf32>
    %46 = arith.addf %39, %40 : vector<8x324xf32>
    %47 = arith.addf %41, %42 : vector<8x324xf32>
    %48 = arith.addf %44, %45 : vector<8x324xf32>
    %49 = arith.addf %46, %47 : vector<8x324xf32>
    %50 = arith.addf %48, %49 : vector<8x324xf32>
    %51 = arith.addf %50, %43 : vector<8x324xf32>
    %52 = vector.broadcast %1 : vector<8x1xf32> to vector<8x324xf32>
    %53 = arith.addf %51, %52 : vector<8x324xf32>
    %54 = arith.negf %53 : vector<8x324xf32>
    %55 = math.exp %54 : vector<8x324xf32>
    %cst_13 = arith.constant 1.000000e+00 : f32
    %56 = vector.broadcast %cst_13 : f32 to vector<8x324xf32>
    %57 = arith.addf %56, %55 : vector<8x324xf32>
    %58 = arith.divf %56, %57 : vector<8x324xf32>
    %c1_14 = arith.constant 1 : index
    %c0_15 = arith.constant 0 : index
    %c0_16 = arith.constant 0 : index
    %59 = vector.load %arg3[%c1_14, %c0_15, %c0_16] : memref<2x8x324xf32, #tpu.memory_space<vmem>>, vector<1x8x324xf32>
    %60 = vector.shape_cast %59 : vector<1x8x324xf32> to vector<8x324xf32>
    %61 = vector.shape_cast %58 : vector<8x324xf32> to vector<1x8x324xf32>
    tpu.vector_store %arg3[%c1_14, %c0_15, %c0_16], %61 {strides = array<i32>} : memref<2x8x324xf32, #tpu.memory_space<vmem>>, vector<1x8x324xf32>,
    return
  }
}

</mosaic_0001>

<bundles_post_ra>
// kernel: conv_transpose2d_sigmoid.1
= control target key start
LH: loop header
LB: loop body
LE: loop exit
PB: predicated region body
PF: predicated region fallthrough
CT: control target
= control target key end

     0   :  { %vm62_vm0 = vcmask 1043456   ;;  %vm34_vm1 = vcmask 31744   ;;  %s901_s10 = smov 16   ;;  %vm210_vm2 = vcmask 7168   ;;  %s902_s11 = smov 17   ;;  %vm228_vm3 = vcmask 130048   ;;  %s1296_s0 = inlined_call_operand.vmem [shape: f32[2,4,384], index: 0, kind: input, shape index: {}]   ;;  %s1297_s1 = inlined_call_operand.vmem [shape: f32[72,4], index: 1, kind: input, shape index: {}]   ;;  %s1298_s2 = inlined_call_operand.vmem [shape: f32[8,1], index: 2, kind: input, shape index: {}]   ;;  %s1299_s3 = inlined_call_operand.vmem [shape: f32[2,8,324], index: 3, kind: output, shape index: {}]  }
   0x1   :  { %v24_v0 = vld [vmem:[%s1296_s0] sm:$0xff]  ;;  %v25_v1 = vld [vmem:[%s1296_s0 + $0x8] sm:$0xf]  ;;  %v827_v2 = vld [vmem:[%s1296_s0 + $0xc] sm:$0xff]  ;;  %s903_s12 = smov 2   ;;  %s904_s13 = smov 38  }
   0x2   :  { %28 = vst [vmem:[#allocation1] ss:$2 sm:$0xff] %v24_v0  ;;  %v14_v3 = vld [vmem:[%s1297_s1] sm:$0xff]  ;;  %v943_v4 = vld [vmem:[%s1297_s1 + $0x28] sm:$0xff]  ;;  %v828_v5 = vld [vmem:[%s1296_s0 + $0x14] sm:$0xf] }
   0x3   :  { %30 = vst [vmem:[#allocation1 + $0x10] ss:$2 sm:$0xff] %v25_v1  ;;  %v15_v9 = vld [vmem:[%s1297_s1 + $0x8] sm:$0xff]  ;;  %v20_v10 = vld [vmem:[%s1297_s1 + $0x30] sm:$0xff]  ;;  %v21_v15 = vld [vmem:[%s1297_s1 + $0x38] sm:$0xff]  ;;  %s905_s14 = smov 19  }
   0x4   :  { %v16_v14 = vld [vmem:[%s1297_s1 + $0x10] sm:$0xff]  ;;  %v17_v16 = vld [vmem:[%s1297_s1 + $0x18] sm:$0xff]  ;;  %v22_v17 = vld [vmem:[%s1297_s1 + $0x40] sm:$0xff]  ;;  %vm298_vm4 = vcmask 138240   ;;  %vm280_vm5 = vcmask 15360   ;;  %vm316_vm6 = vcmask 154624  }
   0x5   :  { %v18_v18 = vld [vmem:[%s1297_s1 + $0x20] sm:$0xff]  ;;  %s900_s1 = smov 1   ;;  %vm334_vm7 = vcmask 310272  }
   0x9   :  { %v31_v6 = vld.sshfl [vmem:[#allocation1] sm:$0xff pattern:$0x75316420]  ;;  %v32_v7 = vld.sshfl [vmem:[#allocation1 + $0x8] sm:$0xff pattern:$0x75316420] }
   0xa   :  { %794 = vmatpush.msk.msra.mxu0 %vm62_vm0, %v31_v6  ;;  %865 = vmatpush.msk.msra.mxu2 %vm62_vm0, %v31_v6  ;;  %432 = vst [vmem:[#allocation1] ss:$2 sm:$0xff] %v827_v2  ;;  %v33_v8 = vld.sshfl [vmem:[#allocation1 + $0x10] sm:$0xff pattern:$0x75316420] }
   0xb   :  { %866 = vmatpush.msk.msra.mxu3 %vm62_vm0, %v32_v7  ;;  %795 = vmatmul.msk.f32.vlgmr.msra.gmra.mxu0 %vm34_vm1, %v14_v3  ;;  %434 = vst [vmem:[#allocation1 + $0x10] ss:$2 sm:$0xff] %v828_v5 }
   0xc   :  { %800 = vmatmul.msk.f32.vlgmr.msra.gmra.mxu2 %vm34_vm1, %v943_v4  ;;  %810 = vmatmul.msk.f32.vlgmr.msra.gmra.mxu3 %vm34_vm1, %v943_v4 }
   0xd   :  { %814 = vmatpush.msk.msrb.mxu2 %vm62_vm0, %v33_v8  ;;  %804 = vmatpush.msk.msra.mxu1 %vm62_vm0, %v32_v7 }
   0xe   :  { %805 = vmatmul.msk.f32.vlgmr.msra.gmra.mxu1 %vm34_vm1, %v14_v3 }
  0x11   :  { %v435_v11 = vld.sshfl [vmem:[#allocation1] sm:$0xff pattern:$0x75316420]  ;;  %v436_v12 = vld.sshfl [vmem:[#allocation1 + $0x8] sm:$0xff pattern:$0x75316420] }
  0x12   :  { %829 = vmatpush.msk.msrb.mxu3 %vm62_vm0, %v435_v11  ;;  %839 = vmatpush.msk.msrb.mxu0 %vm62_vm0, %v436_v12  ;;  %v437_v13 = vld.sshfl [vmem:[#allocation1 + $0x10] sm:$0xff pattern:$0x75316420] }
  0x13   :  { %796 = vmatmul.msk.f32.gmra.mxu0 %vm34_vm1, %v15_v9  ;;  %849 = vmatpush.msk.msrb.mxu1 %vm62_vm0, %v437_v13 }
  0x14   :  { %801 = vmatmul.msk.f32.gmra.mxu2 %vm34_vm1, %v20_v10  ;;  %811 = vmatmul.msk.f32.gmra.mxu3 %vm34_vm1, %v20_v10 }
  0x16   :  { %806 = vmatmul.msk.f32.gmra.mxu1 %vm34_vm1, %v15_v9 }
  0x1b   :  { %797 = vmatmul.msk.f32.gmra.mxu0 %vm34_vm1, %v16_v14 }
  0x1c   :  { %802 = vmatmul.msk.f32.gmra.mxu2 %vm34_vm1, %v21_v15  ;;  %812 = vmatmul.msk.f32.gmra.mxu3 %vm34_vm1, %v21_v15 }
  0x1e   :  { %807 = vmatmul.msk.f32.gmra.mxu1 %vm34_vm1, %v16_v14 }
  0x23   :  { %798 = vmatmul.msk.f32.gmra.mxu0 %vm34_vm1, %v17_v16 }
  0x24   :  { %803 = vmatmul.msk.f32.gmra.mxu2 %vm34_vm1, %v22_v17  ;;  %813 = vmatmul.msk.f32.gmra.mxu3 %vm34_vm1, %v22_v17 }
  0x26   :  { %808 = vmatmul.msk.f32.gmra.mxu1 %vm34_vm1, %v17_v16 }
  0x2b   :  { %799 = vmatmul.msk.f32.gmra.mxu0 %vm34_vm1, %v18_v18 }
  0x2c   :  { %815 = vmatmul.msk.f32.vlgmr.msrb.gmra.mxu2 %vm34_vm1, %v14_v3  ;;  %830 = vmatmul.msk.f32.vlgmr.msrb.gmra.mxu3 %vm34_vm1, %v14_v3 }
  0x2e   :  { %809 = vmatmul.msk.f32.gmra.mxu1 %vm34_vm1, %v18_v18 }
  0x33   :  { %840 = vmatmul.msk.f32.vlgmr.msrb.gmra.mxu0 %vm34_vm1, %v14_v3 }
  0x34   :  { %816 = vmatmul.msk.f32.gmra.mxu2 %vm34_vm1, %v15_v9  ;;  %831 = vmatmul.msk.f32.gmra.mxu3 %vm34_vm1, %v15_v9 }
  0x36   :  { %850 = vmatmul.msk.f32.vlgmr.msrb.gmra.mxu1 %vm34_vm1, %v14_v3 }
  0x3b   :  { %841 = vmatmul.msk.f32.gmra.mxu0 %vm34_vm1, %v15_v9 }
  0x3c   :  { %817 = vmatmul.msk.f32.gmra.mxu2 %vm34_vm1, %v16_v14  ;;  %832 = vmatmul.msk.f32.gmra.mxu3 %vm34_vm1, %v16_v14 }
  0x3e   :  { %851 = vmatmul.msk.f32.gmra.mxu1 %vm34_vm1, %v15_v9 }
  0x43   :  { %842 = vmatmul.msk.f32.gmra.mxu0 %vm34_vm1, %v16_v14 }
  0x44   :  { %818 = vmatmul.msk.f32.gmra.mxu2 %vm34_vm1, %v17_v16  ;;  %833 = vmatmul.msk.f32.gmra.mxu3 %vm34_vm1, %v17_v16 }
  0x46   :  { %852 = vmatmul.msk.f32.gmra.mxu1 %vm34_vm1, %v16_v14 }
  0x4b   :  { %843 = vmatmul.msk.f32.gmra.mxu0 %vm34_vm1, %v17_v16 }
  0x4c   :  { %819 = vmatmul.msk.f32.gmra.mxu2 %vm34_vm1, %v18_v18  ;;  %834 = vmatmul.msk.f32.gmra.mxu3 %vm34_vm1, %v18_v18 }
  0x4e   :  { %853 = vmatmul.msk.f32.gmra.mxu1 %vm34_vm1, %v17_v16 }
  0x53   :  { %844 = vmatmul.msk.f32.gmra.mxu0 %vm34_vm1, %v18_v18 }
  0x54   :  { %820 = vmatmul.msk.f32.gmra.mxu2 %vm34_vm1, %v943_v4  ;;  %835 = vmatmul.msk.f32.gmra.mxu3 %vm34_vm1, %v943_v4 }
  0x56   :  { %854 = vmatmul.msk.f32.gmra.mxu1 %vm34_vm1, %v18_v18 }
  0x5b   :  { %845 = vmatmul.msk.f32.gmra.mxu0 %vm34_vm1, %v943_v4 }
  0x5c   :  { %821 = vmatmul.msk.f32.gmra.mxu2 %vm34_vm1, %v20_v10  ;;  %836 = vmatmul.msk.f32.gmra.mxu3 %vm34_vm1, %v20_v10 }
  0x5e   :  { %855 = vmatmul.msk.f32.gmra.mxu1 %vm34_vm1, %v943_v4 }
  0x63   :  { %846 = vmatmul.msk.f32.gmra.mxu0 %vm34_vm1, %v20_v10 }
  0x64   :  { %822 = vmatmul.msk.f32.gmra.mxu2 %vm34_vm1, %v21_v15  ;;  %837 = vmatmul.msk.f32.gmra.mxu3 %vm34_vm1, %v21_v15 }
  0x66   :  { %856 = vmatmul.msk.f32.gmra.mxu1 %vm34_vm1, %v20_v10 }
  0x6b   :  { %847 = vmatmul.msk.f32.gmra.mxu0 %vm34_vm1, %v21_v15 }
  0x6c   :  { %838 = vmatmul.msk.f32.gmra.mxu3 %vm34_vm1, %v22_v17  ;;  %823 = vmatmul.msk.f32.gmra.mxu2 %vm34_vm1, %v22_v17 }
  0x6e   :  { %857 = vmatmul.msk.f32.gmra.mxu1 %vm34_vm1, %v21_v15 }
  0x73   :  { %848 = vmatmul.msk.f32.gmra.mxu0 %vm34_vm1, %v22_v17 }
  0x76   :  { %858 = vmatmul.msk.f32.gmra.mxu1 %vm34_vm1, %v22_v17 }
  0x88   :  { %v1037_v19 = vpop.f32.mrf.mxu0 }
  0x8b   :  { %v1039_v20 = vpop.f32.mrf.mxu1 }
  0x8f   :  { %v101_v21 = vpop.f32.mrf.mxu2  ;;  %v145_v22 = vpop.f32.mrf.mxu3 }
  0x90   :  { %242 = vrot.lane.b32.xlu1 %v145_v22, %s900_s1  ;;  %240 = vrot.lane.b32.xlu0 %v101_v21, %s900_s1  ;;  %v89_v23 = vpop.f32.mrf.mxu0 }
  0x93   :  { %v1043_v24 = vpop.f32.mrf.mxu1 }
  0x97   :  { %v1045_v25 = vpop.f32.mrf.mxu2  ;;  %v1047_v26 = vpop.f32.mrf.mxu3 }
  0x98   :  { %v1049_v27 = vpop.f32.mrf.mxu0 }
  0x9b   :  { %v1051_v28 = vpop.f32.mrf.mxu1 }
  0x9f   :  { %v107_v29 = vpop.f32.mrf.mxu2  ;;  %v151_v30 = vpop.f32.mrf.mxu3 }
  0xa0   :  { %257 = vrot.lane.b32.xlu0 %v107_v29, %s900_s1  ;;  %v95_v31 = vpop.f32.mrf.mxu0 }
  0xa3   :  { %v139_v32 = vpop.f32.mrf.mxu1 }
  0xa4   :  { %224 = vrot.lane.b32.xlu1 %v139_v32, %s901_s10 }
  0xa7   :  { %v1054_v33 = vpop.f32.mrf.mxu2  ;;  %v1056_v34 = vpop.f32.mrf.mxu3 }
  0xa8   :  { %259 = vrot.lane.b32.xlu0 %v151_v30, %s900_s1  ;;  %v1059_v35 = vpop.f32.mrf.mxu0 }
  0xab   :  { %v1061_v36 = vpop.f32.mrf.mxu1 }
  0xaf   :  { %v1063_v37 = vpop.f32.mrf.mxu2  ;;  %v1065_v38 = vpop.f32.mrf.mxu3 }
  0xb0   :  { %222 = vrot.lane.b32.xlu0 %v95_v31, %s901_s10  ;;  %v1067_v39 = vpop.f32.mrf.mxu0 }
  0xb3   :  { %v1069_v40 = vpop.f32.mrf.mxu1 }
  0xb7   :  { %v177_v41 = vpop.f32.mrf.mxu2  ;;  %v464_v42 = vpop.f32.mrf.mxu3 }
  0xb8   :  { %v508_v43 = vpop.f32.mrf.mxu0 }
  0xbb   :  { %v552_v44 = vpop.f32.mrf.mxu1 }
  0xbf   :  { %v1071_v45 = vpop.f32.mrf.mxu2  ;;  %v1073_v46 = vpop.f32.mrf.mxu3 }
  0xc0   :  { %v1075_v47 = vpop.f32.mrf.mxu0 }
  0xc3   :  { %v1077_v48 = vpop.f32.mrf.mxu1 }
  0xc7   :  { %v183_v49 = vpop.f32.mrf.mxu2  ;;  %v470_v50 = vpop.f32.mrf.mxu3 }
  0xc8   :  { %226 = vrot.lane.b32.xlu2 %v183_v49, %s901_s10  ;;  %596 = vrot.lane.b32.xlu0 %v470_v50, %s901_s10  ;;  %v514_v51 = vpop.f32.mrf.mxu0 }
  0xc9   :  { %598 = vrot.lane.b32.xlu1 %v514_v51, %s901_s10 }
  0xcb   :  { %v558_v52 = vpop.f32.mrf.mxu1 }
  0xcf   :  { %v1079_v53 = vpop.f32.mrf.mxu2  ;;  %v1081_v54 = vpop.f32.mrf.mxu3 }
  0xd0   :  { %600 = vrot.lane.b32.xlu2 %v558_v52, %s901_s10  ;;  %v1083_v55 = vpop.f32.mrf.mxu0 }
  0xd3   :  { %v1085_v56 = vpop.f32.mrf.mxu1 }
  0xd7   :  { %v189_v57 = vpop.f32.mrf.mxu2  ;;  %v476_v58 = vpop.f32.mrf.mxu3 }
  0xd8   :  { %244 = vrot.lane.b32.xlu2 %v189_v57, %s900_s1  ;;  %613 = vrot.lane.b32.xlu0 %v476_v58, %s900_s1  ;;  %v520_v59 = vpop.f32.mrf.mxu0 }
  0xdb   :  { %v564_v60 = vpop.f32.mrf.mxu1 }
  0xdf   :  { %v192_v61 = vpop.f32.mrf.mxu2  ;;  %v479_v63 = vpop.f32.mrf.mxu3 }
  0xe0   :  { %204 = vrot.lane.b32.xlu0 %v89_v23, %s900_s1  ;;  %v523_v62 = vpop.f32.mrf.mxu0 }
  0xe3   :  { %v567_v0 = vpop.f32.mrf.mxu1 }
  0xe7   :  { %v195_v1 = vpop.f32.mrf.mxu2  ;;  %v482_v3 = vpop.f32.mrf.mxu3 }
  0xe8   :  { %579 = vrot.lane.b32.xlu0 %v464_v42, %s900_s1  ;;  %261 = vrot.lane.b32.xlu1 %v195_v1, %s900_s1  ;;  %v526_v2 = vpop.f32.mrf.mxu0 }
  0xe9   :  { %632 = vrot.lane.b32.xlu2 %v526_v2, %s900_s1 }
  0xeb   :  { %v570_v4 = vpop.f32.mrf.mxu1 }
  0xf0   :  { %630 = vrot.lane.b32.xlu1 %v482_v3, %s900_s1 }
  0xf1   :  { %634 = vrot.lane.b32.xlu2 %v570_v4, %s900_s1  ;;  %v485_v4 = vpop.f32.mrf.mxu3 }
  0xf8   :  { %615 = vrot.lane.b32.xlu1 %v520_v59, %s900_s1 }
  0xf9   :  { %617 = vrot.lane.b32.xlu2 %v564_v60, %s900_s1 }
 0x100   :  { %206 = vrot.lane.b32.xlu1 %v1043_v24, %s900_s1 }
 0x101   :  { %208 = vrot.lane.b32.xlu2 %v177_v41, %s900_s1 }
 0x102   :  { %v243_v5 = vpop.permute.xlu1 %242  ;;  %v1100_v6 = vpop.permute.xlu0 %240 }
 0x103   :  { %v1104_v7 = vsel %vm210_vm2, %v1100_v6, %v243_v5 }
 0x108   :  { %581 = vrot.lane.b32.xlu1 %v508_v43, %s900_s1 }
 0x109   :  { %583 = vrot.lane.b32.xlu2 %v552_v44, %s900_s1 }
 0x112   :  { %v258_v8 = vpop.permute.xlu0 %257 }
 0x113   :  { %v268_v9 = vadd.f32 %v258_v8, %v1045_v25 }
 0x115   :  { %292 = vrot.lane.b32.xlu0 %v268_v9, %s902_s11 }
 0x116   :  { %v225_v21 = vpop.permute.xlu1 %224 }
 0x11a   :  { %v260_v10 = vpop.permute.xlu0 %259 }
 0x11b   :  { %v263_v11 = vsel %vm210_vm2, %v258_v8, %v260_v10 }
 0x11c   :  { %v269_v12 = vadd.f32 %v263_v11, %v1047_v26 }
 0x11e   :  { %294 = vrot.lane.b32.xlu1 %v269_v12, %s902_s11  ;;  %v252_v12 = vadd.f32 %v1104_v7, %v1061_v36 }
 0x122   :  { %v227_v13 = vpop.permute.xlu2 %226  ;;  %v223_v14 = vpop.permute.xlu0 %222 }
 0x123   :  { %v234_v15 = vadd.f32 %v223_v14, %v1049_v27  ;;  %v230_v50 = vsel %vm228_vm3, %v225_v21, %v227_v13  ;;  %v229_v51 = vsel %vm228_vm3, %v223_v14, %v225_v21 }
 0x124   :  { %v236_v59 = vadd.f32 %v230_v50, %v1071_v45  ;;  %v235_v60 = vadd.f32 %v229_v51, %v1051_v28 }
 0x125   :  { %274 = vrot.lane.b32.xlu0 %v234_v15, %s903_s12 }
 0x12a   :  { %v601_v16 = vpop.permute.xlu2 %600 }
 0x132   :  { %v245_v17 = vpop.permute.xlu2 %244 }
 0x133   :  { %v1116_v18 = vsel %vm210_vm2, %v243_v5, %v245_v17 }
 0x13a   :  { %v597_v30 = vpop.permute.xlu0 %596 }
 0x13b   :  { %v599_v22 = vpop.permute.xlu1 %598  ;;  %v607_v57 = vadd.f32 %v597_v30, %v1073_v46 }
 0x143   :  { %v633_v23 = vpop.permute.xlu2 %632 }
 0x14a   :  { %v614_v44 = vpop.permute.xlu0 %613 }
 0x14b   :  { %v635_v26 = vpop.permute.xlu2 %634  ;;  %v624_v36 = vadd.f32 %v614_v44, %v1081_v54  ;;  %v23_v54 = vld [vmem:[%s1298_s2] sm:$0xff]  ;;  %s907_s2 = smov 90  }
 0x14c   :  { %v637_v27 = vsel %vm210_vm2, %v633_v23, %v635_v26 }
 0x14d   :  { %v643_v42 = vadd.f32 %v637_v27, %v567_v0  ;;  %v603_v0 = vsel %vm228_vm3, %v599_v22, %v601_v16 }
 0x14e   :  { %v609_v2 = vadd.f32 %v603_v0, %v1077_v48  ;;  %v198_v48 = vpop.f32.mrf.mxu2 }
 0x153   :  { %v618_v49 = vpop.permute.xlu2 %617 }
 0x15a   :  { %v262_v24 = vpop.permute.xlu1 %261 }
 0x15b   :  { %v264_v25 = vsel %vm210_vm2, %v260_v10, %v262_v24 }
 0x15c   :  { %v270_v29 = vadd.f32 %v264_v25, %v192_v61  ;;  %v1134_v61 = vpop.permute.xlu0 %204 }
 0x15e   :  { %296 = vrot.lane.b32.xlu2 %v270_v29, %s902_s11 }
 0x162   :  { %v631_v31 = vpop.permute.xlu1 %630 }
 0x163   :  { %v636_v32 = vsel %vm210_vm2, %v631_v31, %v633_v23  ;;  %v641_v41 = vadd.f32 %v631_v31, %v479_v63  ;;  %v602_v63 = vsel %vm228_vm3, %v597_v30, %v599_v22  ;;  %v529_v31 = vpop.f32.mrf.mxu0 }
 0x164   :  { %v642_v43 = vadd.f32 %v636_v32, %v523_v62  ;;  %v209_v62 = vpop.permute.xlu2 %208  ;;  %v608_v45 = vadd.f32 %v602_v63, %v1075_v47  ;;  %v1151_v3 = vpop.permute.xlu0 %579 }
 0x165   :  { %664 = vrot.lane.b32.xlu0 %v641_v41, %s902_s11  ;;  %v590_v0 = vadd.f32 %v1151_v3, %v1065_v38 }
 0x166   :  { %666 = vrot.lane.b32.xlu1 %v642_v43, %s902_s11  ;;  %668 = vrot.lane.b32.xlu2 %v643_v42, %s902_s11 }
 0x16a   :  { %v616_v52 = vpop.permute.xlu1 %615 }
 0x16b   :  { %v619_v58 = vsel %vm210_vm2, %v614_v44, %v616_v52  ;;  %v620_v22 = vsel %vm210_vm2, %v616_v52, %v618_v49 }
 0x16c   :  { %v584_v5 = vpop.permute.xlu2 %583  ;;  %v625_v23 = vadd.f32 %v619_v58, %v1083_v55  ;;  %v626_v24 = vadd.f32 %v620_v22, %v1085_v56  ;;  %v573_v55 = vpop.f32.mrf.mxu1 }
 0x16d   :  { %647 = vrot.lane.b32.xlu0 %v607_v57, %s903_s12 }
 0x16e   :  { %276 = vrot.lane.b32.xlu1 %v235_v60, %s903_s12  ;;  %278 = vrot.lane.b32.xlu2 %v236_v59, %s903_s12  ;;  %v216_v60 = vadd.f32 %v1134_v61, %v1037_v19 }
 0x172   :  { %v207_v46 = vpop.permute.xlu1 %206 }
 0x173   :  { %v1140_v1 = vsel %vm210_vm2, %v1134_v61, %v207_v46  ;;  %v1143_v28 = vsel %vm210_vm2, %v207_v46, %v209_v62 }
 0x174   :  { %v217_v62 = vadd.f32 %v1140_v1, %v1039_v20  ;;  %v218_v46 = vadd.f32 %v1143_v28, %v1063_v37 }
 0x175   :  { %328 = vrot.lane.b32.xlu0 %v1054_v33, %s904_s13  ;;  %v251_v33 = vadd.f32 %v1100_v6, %v1059_v35  ;;  %v906_v6 = vmov 0  }
 0x176   :  { %649 = vrot.lane.b32.xlu1 %v608_v45, %s903_s12  ;;  %651 = vrot.lane.b32.xlu2 %v609_v2, %s903_s12 }
 0x177   :  { %875 = vset.pattern.permute.xlu0 %v906_v6 }
 0x17a   :  { %v582_v8 = vpop.permute.xlu1 %581 }
 0x17b   :  { %v1155_v9 = vsel %vm210_vm2, %v1151_v3, %v582_v8  ;;  %v1158_v47 = vsel %vm210_vm2, %v582_v8, %v584_v5 }
 0x17c   :  { %v591_v38 = vadd.f32 %v1155_v9, %v1067_v39 }
 0x17d   :  { %698 = vrot.lane.b32.xlu0 %v485_v4, %s904_s13 }
 0x17e   :  { %330 = vrot.lane.b32.xlu1 %v1056_v34, %s904_s13  ;;  %332 = vrot.lane.b32.xlu2 %v198_v48, %s904_s13  ;;  %v253_v34 = vadd.f32 %v1116_v18, %v1079_v53 }
 0x187   :  { %v293_v10 = vpop.permute.xlu0 %292 }
 0x188   :  { %v304_v11 = vadd.f32 %v293_v10, %v251_v33 }
 0x18a   :  { %310 = vrot.lane.b32.xlu0 %v304_v11, %s905_s14 }
 0x190   :  { %v295_v13 = vpop.permute.xlu1 %294 }
 0x191   :  { %v299_v14 = vsel %vm298_vm4, %v293_v10, %v295_v13 }
 0x192   :  { %v305_v15 = vadd.f32 %v299_v14, %v252_v12  ;;  %v592_v12 = vadd.f32 %v1158_v47, %v1069_v40 }
 0x194   :  { %312 = vrot.lane.b32.xlu1 %v305_v15, %s905_s14 }
 0x197   :  { %v275_v21 = vpop.permute.xlu0 %274 }
 0x198   :  { %v286_v2 = vadd.f32 %v275_v21, %v216_v60 }
 0x1b8   :  { %v297_v16 = vpop.permute.xlu2 %296 }
 0x1b9   :  { %v300_v17 = vsel %vm298_vm4, %v295_v13, %v297_v16 }
 0x1ba   :  { %v306_v35 = vadd.f32 %v300_v17, %v253_v34 }
 0x1bc   :  { %314 = vrot.lane.b32.xlu2 %v306_v35, %s905_s14 }
 0x1c0   :  { %v669_v25 = vpop.permute.xlu2 %668 }
 0x1c8   :  { %v279_v41 = vpop.permute.xlu2 %278 }
 0x1d0   :  { %v652_v44 = vpop.permute.xlu2 %651 }
 0x1d7   :  { %v665_v7 = vpop.permute.xlu0 %664 }
 0x1d8   :  { %v675_v26 = vadd.f32 %v665_v7, %v624_v36  ;;  %v667_v53 = vpop.permute.xlu1 %666  ;;  %v333_v50 = vpop.permute.xlu2 %332 }
 0x1d9   :  { %v670_v18 = vsel %vm298_vm4, %v665_v7, %v667_v53  ;;  %v671_v29 = vsel %vm298_vm4, %v667_v53, %v669_v25 }
 0x1da   :  { %v676_v30 = vadd.f32 %v670_v18, %v625_v23  ;;  %v677_v27 = vadd.f32 %v671_v29, %v626_v24  ;;  %681 = vrot.lane.b32.xlu0 %v675_v26, %s905_s14 }
 0x1dc   :  { %683 = vrot.lane.b32.xlu1 %v676_v30, %s905_s14  ;;  %685 = vrot.lane.b32.xlu2 %v677_v27, %s905_s14 }
 0x1df   :  { %v648_v56 = vpop.permute.xlu0 %647 }
 0x1e0   :  { %v277_v32 = vpop.permute.xlu1 %276  ;;  %v658_v48 = vadd.f32 %v648_v56, %v590_v0 }
 0x1e1   :  { %v281_v59 = vsel %vm280_vm5, %v275_v21, %v277_v32  ;;  %v282_v63 = vsel %vm280_vm5, %v277_v32, %v279_v41 }
 0x1e2   :  { %345 = vperm.xlu0 %875, %v23_v54   ;;  %v287_v4 = vadd.f32 %v281_v59, %v217_v62  ;;  %v288_v19 = vadd.f32 %v282_v63, %v218_v46 }
 0x1e4   :  { %700 = vrot.lane.b32.xlu1 %v529_v31, %s904_s13  ;;  %702 = vrot.lane.b32.xlu2 %v573_v55, %s904_s13 }
 0x1e7   :  { %v329_v42 = vpop.permute.xlu0 %328 }
 0x1e8   :  { %v650_v43 = vpop.permute.xlu1 %649 }
 0x1e9   :  { %v653_v37 = vsel %vm280_vm5, %v648_v56, %v650_v43  ;;  %v654_v28 = vsel %vm280_vm5, %v650_v43, %v652_v44 }
 0x1ea   :  { %v659_v39 = vadd.f32 %v653_v37, %v591_v38  ;;  %v660_v9 = vadd.f32 %v654_v28, %v592_v12 }
 0x1ef   :  { %v699_v49 = vpop.permute.xlu0 %698 }
 0x1f0   :  { %v331_v51 = vpop.permute.xlu1 %330 }
 0x1f1   :  { %v335_v3 = vsel %vm334_vm7, %v329_v42, %v331_v51  ;;  %v336_v13 = vsel %vm334_vm7, %v331_v51, %v333_v50 }
 0x1fc   :  { %v311_v52 = vpop.permute.xlu0 %310 }
 0x1fd   :  { %v322_v20 = vadd.f32 %v311_v52, %v286_v2 }
 0x1ff   :  { %v340_v14 = vadd.f32 %v329_v42, %v322_v20 }
 0x206   :  { %v313_v58 = vpop.permute.xlu1 %312 }
 0x207   :  { %v317_v45 = vsel %vm316_vm6, %v311_v52, %v313_v58 }
 0x208   :  { %v323_v1 = vadd.f32 %v317_v45, %v287_v4 }
 0x20a   :  { %v341_v15 = vadd.f32 %v335_v3, %v323_v1 }
 0x216   :  { %v315_v57 = vpop.permute.xlu2 %314 }
 0x217   :  { %v318_v5 = vsel %vm316_vm6, %v313_v58, %v315_v57 }
 0x218   :  { %v324_v10 = vadd.f32 %v318_v5, %v288_v19 }
 0x21a   :  { %v342_v34 = vadd.f32 %v336_v13, %v324_v10 }
 0x236   :  { %v686_v61 = vpop.permute.xlu2 %685 }
 0x23e   :  { %v703_v23 = vpop.permute.xlu2 %702 }
 0x24c   :  { %v682_v8 = vpop.permute.xlu0 %681 }
 0x24d   :  { %v692_v11 = vadd.f32 %v682_v8, %v658_v48 }
 0x24e   :  { %v684_v33 = vpop.permute.xlu1 %683 }
 0x24f   :  { %v709_v16 = vadd.f32 %v699_v49, %v692_v11  ;;  %v687_v17 = vsel %vm316_vm6, %v682_v8, %v684_v33  ;;  %v688_v35 = vsel %vm316_vm6, %v684_v33, %v686_v61 }
 0x250   :  { %v693_v24 = vadd.f32 %v687_v17, %v659_v39  ;;  %v694_v40 = vadd.f32 %v688_v35, %v660_v9 }
 0x254   :  { %v346_v6 = vpop.permute.xlu0 %345 }
 0x255   :  { %v348_v21 = vadd.f32 %v346_v6, %v340_v14  ;;  %v349_v22 = vadd.f32 %v346_v6, %v341_v15  ;;  %v350_v36 = vadd.f32 %v346_v6, %v342_v34  ;;  %v712_v7 = vadd.f32 %v709_v16, %v346_v6 }
 0x256   :  { %v701_v47 = vpop.permute.xlu1 %700 }
 0x257   :  { %v824_v25 = vmul.f32 -1.442695, %v348_v21  ;;  %v825_v26 = vmul.f32 -1.442695, %v349_v22  ;;  %v826_v53 = vmul.f32 -1.442695, %v350_v36  ;;  %v704_v18 = vsel %vm334_vm7, %v699_v49, %v701_v47 }
 0x258   :  { %v859_v29 = vmul.f32 -1.442695, %v712_v7  ;;  %v705_v30 = vsel %vm334_vm7, %v701_v47, %v703_v23  ;;  %v710_v27 = vadd.f32 %v704_v18, %v693_v24 }
 0x259   :  { %876 = vpow2.f32 %v824_v25  ;;  %v711_v54 = vadd.f32 %v705_v30, %v694_v40 }
 0x25a   :  { %878 = vpow2.f32 %v825_v26  ;;  %v713_v31 = vadd.f32 %v710_v27, %v346_v6 }
 0x25b   :  { %880 = vpow2.f32 %v826_v53  ;;  %v714_v55 = vadd.f32 %v711_v54, %v346_v6 }
 0x25c   :  { %882 = vpow2.f32 %v859_v29  ;;  %v860_v56 = vmul.f32 -1.442695, %v713_v31 }
 0x25d   :  { %v861_v32 = vmul.f32 -1.442695, %v714_v55 }
 0x25e   :  { %884 = vpow2.f32 %v860_v56 }
 0x25f   :  { %v877_v41 = vpop.eup %876  ;;  %886 = vpow2.f32 %v861_v32 }
 0x260   :  { %v879_v42 = vpop.eup %878  ;;  %v360_v43 = vadd.f32 1.0, %v877_v41 }
 0x261   :  { %v881_v44 = vpop.eup %880  ;;  %v361_v49 = vadd.f32 1.0, %v879_v42 }
 0x262   :  { %v883_v50 = vpop.eup %882  ;;  %v1207_v51 = vadd.f32 1.0, %v881_v44  ;;  %888 = vrcp.f32 %v360_v43  ;;  %v372_v63 = vand.u32 2147483647, %v360_v43  ;;  %vm368_vm8 = vweird.f32 %v360_v43 }
 0x263   :  { %890 = vrcp.f32 %v361_v49  ;;  %v1209_v52 = vadd.f32 1.0, %v883_v50  ;;  %v387_v46 = vand.u32 2147483647, %v361_v49  ;;  %vm383_vm9 = vweird.f32 %v361_v49 }
 0x264   :  { %v885_v57 = vpop.eup %884  ;;  %892 = vrcp.f32 %v1207_v51  ;;  %v389_v8 = vand.u32 2147483648, %v361_v49  ;;  %vm1225_vm10 = vcmp.eq.f32.partialorder %v372_v63, 8.507059e+37  ;;  %v374_v1 = vand.u32 2147483648, %v360_v43 }
 0x265   :  { %v887_v58 = vpop.eup %886  ;;  %894 = vrcp.f32 %v1209_v52  ;;  %v1213_v59 = vadd.f32 1.0, %v885_v57  ;;  %vm1231_vm11 = vcmp.eq.f32.partialorder %v387_v46, 8.507059e+37  ;;  %v404_v26 = vand.u32 2147483648, %v1207_v51 }
 0x266   :  { %v1215_v60 = vadd.f32 1.0, %v887_v58  ;;  %v390_v14 = vor.u32 1.1754944e-38, %v389_v8  ;;  %v375_v35 = vor.u32 1.1754944e-38, %v374_v1  ;;  %vm398_vm5 = vweird.f32 %v1207_v51 }
 0x267   :  { %896 = vrcp.f32 %v1213_v59  ;;  %vm747_vm0 = vweird.f32 %v1213_v59  ;;  %v751_v21 = vand.u32 2147483647, %v1213_v59  ;;  %v753_v22 = vand.u32 2147483648, %v1213_v59 }
 0x268   :  { %v889_v62 = vpop.eup %888  ;;  %898 = vrcp.f32 %v1215_v60  ;;  %v402_v29 = vand.u32 2147483647, %v1207_v51  ;;  %v738_v30 = vand.u32 2147483648, %v1209_v52  ;;  %v736_v54 = vand.u32 2147483647, %v1209_v52 }
 0x269   :  { %v891_v0 = vpop.eup %890  ;;  %v364_v45 = vmul.f32 %v889_v62, %v360_v43  ;;  %vm369_vm12 = vweird.f32 %v889_v62  ;;  %v754_v18 = vor.u32 1.1754944e-38, %v753_v22  ;;  %vm752_vm6 = vcmp.eq.f32.partialorder %v751_v21, 8.507059e+37 }
 0x26a   :  { %v1219_v2 = vpop.eup %892  ;;  %v379_v4 = vmul.f32 %v891_v0, %v361_v49  ;;  %vm384_vm13 = vweird.f32 %v891_v0  ;;  %vm370_vm14 = vmor %vm368_vm8, %vm369_vm12  ;;  %vm732_vm8 = vweird.f32 %v1209_v52  ;;  %v405_v32 = vor.u32 1.1754944e-38, %v404_v26 }
 0x26b   :  { %v1221_v5 = vpop.eup %894  ;;  %v365_v48 = vsub.f32 1.0, %v364_v45  ;;  %v394_v19 = vmul.f32 %v1219_v2, %v1207_v51  ;;  %vm385_vm15 = vmor %vm383_vm9, %vm384_vm13  ;;  %vm399_vm2 = vweird.f32 %v1219_v2  ;;  %v739_v42 = vor.u32 1.1754944e-38, %v738_v30 }
 0x26c   :  { %v380_v61 = vsub.f32 1.0, %v379_v4  ;;  %v728_v33 = vmul.f32 %v1221_v5, %v1209_v52  ;;  %vm733_vm3 = vweird.f32 %v1221_v5  ;;  %vm400_vm7 = vmor %vm398_vm5, %vm399_vm2  ;;  %v768_v50 = vand.u32 2147483648, %v1215_v60 }
 0x26d   :  { %v897_v10 = vpop.eup %896  ;;  %v366_v38 = vmul.f32 %v889_v62, %v365_v48  ;;  %v395_v37 = vsub.f32 1.0, %v394_v19  ;;  %vm734_vm9 = vmor %vm732_vm8, %vm733_vm3  ;;  %vm762_vm13 = vweird.f32 %v1215_v60  ;;  %v766_v51 = vand.u32 2147483647, %v1215_v60 }
 0x26e   :  { %v1235_v28 = vpop.eup %898  ;;  %v381_v3 = vmul.f32 %v891_v0, %v380_v61  ;;  %v743_v12 = vmul.f32 %v897_v10, %v1213_v59  ;;  %v729_v13 = vsub.f32 1.0, %v728_v33  ;;  %vm748_vm1 = vweird.f32 %v897_v10 }
 0x26f   :  { %v367_v15 = vadd.f32 %v889_v62, %v366_v38  ;;  %v396_v34 = vmul.f32 %v1219_v2, %v395_v37  ;;  %v758_v16 = vmul.f32 %v1235_v28, %v1215_v60  ;;  %vm749_vm4 = vmor %vm747_vm0, %vm748_vm1  ;;  %vm763_vm12 = vweird.f32 %v1235_v28 }
 0x270   :  { %v382_v17 = vadd.f32 %v891_v0, %v381_v3  ;;  %v744_v39 = vsub.f32 1.0, %v743_v12  ;;  %v730_v9 = vmul.f32 %v1221_v5, %v729_v13  ;;  %v769_v57 = vor.u32 1.1754944e-38, %v768_v50 }
 0x271   :  { %v371_v6 = vsel %vm370_vm14, %v889_v62, %v367_v15  ;;  %v397_v40 = vadd.f32 %v1219_v2, %v396_v34  ;;  %v759_v47 = vsub.f32 1.0, %v758_v16  ;;  %vm764_vm14 = vmor %vm762_vm13, %vm763_vm12  ;;  %vm417_vm0 = vcmask 736256  }
 0x272   :  { %v386_v36 = vsel %vm385_vm15, %v891_v0, %v382_v17  ;;  %v376_v7 = vsel %vm1225_vm10, %v375_v35, %v371_v6  ;;  %v745_v23 = vmul.f32 %v897_v10, %v744_v39  ;;  %v731_v53 = vadd.f32 %v1221_v5, %v730_v9 }
 0x273   :  { %v391_v24 = vsel %vm1231_vm11, %v390_v14, %v386_v36  ;;  %411 = vrot.lane.b32.xlu1 %v376_v7, %s907_s2  ;;  %v401_v55 = vsel %vm400_vm7, %v1219_v2, %v397_v40  ;;  %v760_v56 = vmul.f32 %v1235_v28, %v759_v47  ;;  %vm403_vm10 = vcmp.eq.f32.partialorder %v402_v29, 8.507059e+37 }
 0x274   :  { %413 = vrot.lane.b32.xlu2 %v391_v24, %s907_s2  ;;  %v746_v25 = vadd.f32 %v897_v10, %v745_v23  ;;  %v735_v41 = vsel %vm734_vm9, %v1221_v5, %v731_v53  ;;  %v406_v43 = vsel %vm403_vm10, %v405_v32, %v401_v55  ;;  %vm737_vm11 = vcmp.eq.f32.partialorder %v736_v54, 8.507059e+37 }
 0x275   :  { %v740_v44 = vsel %vm737_vm11, %v739_v42, %v735_v41  ;;  %v761_v49 = vadd.f32 %v1235_v28, %v760_v56  ;;  %vm767_vm15 = vcmp.eq.f32.partialorder %v766_v51, 8.507059e+37  ;;  %vm425_vm1 = vcmask 556032  }
 0x276   :  { %v750_v27 = vsel %vm749_vm4, %v897_v10, %v746_v25 }
 0x277   :  { %v755_v31 = vsel %vm752_vm6, %v754_v18, %v750_v27  ;;  %v765_v52 = vsel %vm764_vm14, %v1235_v28, %v761_v49 }
 0x278   :  { %777 = vrot.lane.b32.xlu0 %v755_v31, %s907_s2  ;;  %v770_v58 = vsel %vm767_vm15, %v769_v57, %v765_v52 }
 0x27b   :  { %415 = vrot.lane.b32.xlu1 %v406_v43, %s907_s2 }
 0x27c   :  { %775 = vrot.lane.b32.xlu2 %v740_v44, %s907_s2 }
 0x283   :  { %779 = vrot.lane.b32.xlu1 %v770_v58, %s907_s2 }
 0x2ce   :  { %v414_v59 = vpop.permute.xlu2 %413 }
 0x2d6   :  { %v776_v0 = vpop.permute.xlu2 %775 }
 0x2e5   :  { %v412_v62 = vpop.permute.xlu1 %411 }
 0x2e6   :  { %v418_v63 = vsel %vm417_vm0, %v412_v62, %v414_v59 }
 0x2e7   :  { %423 = vst [vmem:[%s1299_s3] sm:$0xff] %v418_v63 }
 0x2ea   :  { %v778_v46 = vpop.permute.xlu0 %777 }
 0x2eb   :  { %v781_v45 = vsel %vm417_vm0, %v776_v0, %v778_v46 }
 0x2ec   :  { %862 = vst [vmem:[%s1299_s3 + $0x18] sm:$0xff] %v781_v45 }
 0x2ed   :  { %v416_v60 = vpop.permute.xlu1 %415 }
 0x2ee   :  { %v419_v2 = vsel %vm417_vm0, %v414_v59, %v416_v60  ;;  %426 = vst.msk [vmem:[%s1299_s3 + $0x10] sm:$0xff] %vm425_vm1, %v416_v60 }
 0x2ef   :  { %424 = vst [vmem:[%s1299_s3 + $0x8] sm:$0xff] %v419_v2 }
 0x2f5   :  { %v780_v4 = vpop.permute.xlu1 %779 }
 0x2f6   :  { %v782_v5 = vsel %vm417_vm0, %v778_v46, %v780_v4  ;;  %864 = vst.msk [vmem:[%s1299_s3 + $0x28] sm:$0xff] %vm425_vm1, %v780_v4 }
 0x2f7   :  { %863 = vst [vmem:[%s1299_s3 + $0x20] sm:$0xff] %v782_v5 }

</bundles_post_ra>
